<compile_context>
chip_gen: v6e
topology: v6e:2x2x1
jax: 0.10.0
libtpu: 0.0.40
codegen_flags: <defaults>
</compile_context>

<pallas_src>
import functools

import jax
import jax.numpy as jnp
from jax.experimental import pallas as pl
from jax.experimental.pallas import tpu as pltpu


def _label_smoothing_kernel(
    pred_ref, target_ref, out_ref, *, confidence, smooth_val, total_rows, block_rows
):
    # pred_ref: (TB, C) float in VMEM ; target_ref: (TB, 1) int32 in VMEM
    # out_ref:  (TB, 1) f32 per-row (masked) partial loss.
    i = pl.program_id(0)

    x = pred_ref[...].astype(jnp.float32)                         # (TB, C)

    # log-softmax pieces (lane-axis reductions -> XLU; exp/log -> EUP).
    row_max = jnp.max(x, axis=-1, keepdims=True)                  # (TB, 1)
    shifted = x - row_max                                         # (TB, C)
    lse = jnp.log(jnp.sum(jnp.exp(shifted), axis=-1, keepdims=True))  # (TB, 1)

    # Fused smoothed-target reduce: w == true_dist, sum(w) == 1, so
    #   loss_row = sum(-w * (shifted - lse)) = lse - sum(w * shifted)
    col_ids = jax.lax.broadcasted_iota(jnp.int32, shifted.shape, 1)    # (TB, C)
    w = jnp.where(
        col_ids == target_ref[...],                                    # (TB, C)
        jnp.float32(confidence),
        jnp.float32(smooth_val),
    )
    weighted = jnp.sum(w * shifted, axis=-1, keepdims=True)            # (TB, 1)
    per_row = lse - weighted                                           # (TB, 1)

    # Zero out batch-padding rows (static total_rows).
    row_ids = i * block_rows + jax.lax.broadcasted_iota(
        jnp.int32, per_row.shape, 0
    )
    per_row = jnp.where(row_ids < total_rows, per_row, jnp.float32(0.0))

    out_ref[...] = per_row


def label_smoothing_loss(
    pred,
    target,
    *,
    smoothing=0.1,
    block_rows=None,
    tile_bytes=2 * 1024 * 1024,
    cast_to_bf16=False,
):
    """pred: [B, C] float, target: [B] int -> scalar float32 loss."""
    B, C = pred.shape
    assert C > 1, "label smoothing needs at least 2 classes (divides by C-1)"
    # NOTE: like the PyTorch module, targets must lie in [0, C); there is no
    # ignore_index handling.

    if cast_to_bf16 and pred.dtype == jnp.float32:
        # Optional: halves HBM traffic of the dominant (B, C) read; all math
        # inside the kernel stays f32. Off by default (changes input precision).
        pred = pred.astype(jnp.bfloat16)

    itemsize = jnp.dtype(pred.dtype).itemsize
    sublane = max(8, 32 // itemsize)          # f32 -> 8, bf16 -> 16 rows / vreg

    if block_rows is None:
        # Size the row tile by input BYTES (~2 MiB per tile). Double-buffered
        # inputs (~4 MiB) + the few f32 full-tile intermediates stay well
        # under every generation's scoped VMEM limit.
        tb = max(1, int(tile_bytes) // max(1, C * itemsize))
    else:
        tb = int(block_rows)
    tb = max(sublane, (tb // sublane) * sublane)
    if B <= tb:
        tb = ((B + sublane - 1) // sublane) * sublane   # single small block

    b_pad = ((B + tb - 1) // tb) * tb
    if b_pad != B:
        pred = jnp.pad(pred, ((0, b_pad - B), (0, 0)))
        target = jnp.pad(target, (0, b_pad - B))
    target2d = target.reshape(b_pad, 1).astype(jnp.int32)
    num_blocks = b_pad // tb

    confidence = 1.0 - float(smoothing)
    smooth_val = float(smoothing) / (C - 1)

    per_row = pl.pallas_call(
        functools.partial(
            _label_smoothing_kernel,
            confidence=confidence,
            smooth_val=smooth_val,
            total_rows=int(B),
            block_rows=int(tb),
        ),
        out_shape=jax.ShapeDtypeStruct((b_pad, 1), jnp.float32),
        grid=(num_blocks,),
        in_specs=[
            pl.BlockSpec((tb, C), lambda i: (i, 0)),   # pred tile (C whole, on lanes)
            pl.BlockSpec((tb, 1), lambda i: (i, 0)),   # target tile, same batch index
        ],
        out_specs=pl.BlockSpec((tb, 1), lambda i: (i, 0)),
        compiler_params=pltpu.CompilerParams(
            dimension_semantics=("parallel",),         # shards batch across TCs
            vmem_limit_bytes=48 * 1024 * 1024,         # headroom; < v7x physical
        ),
    )(pred, target2d)

    # Tiny final reduction outside the kernel (keeps the grid axis parallel).
    return jnp.sum(per_row[:, 0]) / jnp.float32(B)


def _reference_loss(pred, target, smoothing=0.1):
    # Pure-JAX reference mirroring the PyTorch module.
    C = pred.shape[-1]
    logp = jax.nn.log_softmax(pred.astype(jnp.float32), axis=-1)
    confidence = 1.0 - smoothing
    true_dist = jnp.full_like(logp, smoothing / (C - 1))
    true_dist = true_dist.at[jnp.arange(pred.shape[0]), target].set(confidence)
    return jnp.mean(jnp.sum(-true_dist * logp, axis=-1))


if __name__ == "__main__":
    key = jax.random.PRNGKey(0)
    k1, k2, k3, k4, k5, k6 = jax.random.split(key, 6)

    # Case 1: aligned small shapes (single block), f32 logits.
    B, C = 8, 32
    pred = jax.random.normal(k1, (B, C), dtype=jnp.float32)
    target = jax.random.randint(k2, (B,), 0, C, dtype=jnp.int32)
    loss = jax.block_until_ready(label_smoothing_loss(pred, target, smoothing=0.1))
    ref = _reference_loss(pred, target, smoothing=0.1)
    assert jnp.allclose(loss, ref, rtol=1e-5, atol=1e-5), (loss, ref)

    # Case 2: un-aligned batch & classes, multiple grid blocks (exercises the
    # padding mask and the "parallel" batch grid axis).
    B2, C2 = 20, 33
    pred2 = jax.random.normal(k3, (B2, C2), dtype=jnp.float32)
    target2 = jax.random.randint(k4, (B2,), 0, C2, dtype=jnp.int32)
    loss2 = jax.block_until_ready(
        label_smoothing_loss(pred2, target2, smoothing=0.1, block_rows=8)
    )
    ref2 = _reference_loss(pred2, target2, smoothing=0.1)
    assert jnp.allclose(loss2, ref2, rtol=1e-5, atol=1e-5), (loss2, ref2)

    # Case 3: bf16 logits (16-row sublane packing path); math stays f32.
    B3, C3 = 16, 64
    pred3 = jax.random.normal(k5, (B3, C3), dtype=jnp.float32).astype(jnp.bfloat16)
    target3 = jax.random.randint(k6, (B3,), 0, C3, dtype=jnp.int32)
    loss3 = jax.block_until_ready(label_smoothing_loss(pred3, target3, smoothing=0.2))
    ref3 = _reference_loss(pred3, target3, smoothing=0.2)
    assert jnp.allclose(loss3, ref3, rtol=1e-4, atol=1e-4), (loss3, ref3)

    print("KERNEL_OK")
</pallas_src>

<mosaic_0001>
module attributes {stable_mosaic.version = 11 : i64} {
  func.func @_label_smoothing_kernel(%arg0: i32, %arg1: memref<8x32xf32, #tpu.memory_space<vmem>>, %arg2: memref<8x1xi32, #tpu.memory_space<vmem>>, %arg3: memref<8x1xf32, #tpu.memory_space<vmem>>) attributes {dimension_semantics = [#tpu.dimension_semantics<parallel>], iteration_bounds = array<i64: 1>, scalar_prefetch = 0 : i64, scratch_operands = 0 : i64, tpu.core_type = #tpu.core_type<tc>, window_params = [{transform_indices = @transform_0, window_bounds = array<i64: 8, 32>}, {transform_indices = @transform_1, window_bounds = array<i64: 8, 1>}, {transform_indices = @transform_2, window_bounds = array<i64: 8, 1>}]} {
    %c0 = arith.constant 0 : index
    %c0_0 = arith.constant 0 : index
    %0 = vector.load %arg1[%c0, %c0_0] : memref<8x32xf32, #tpu.memory_space<vmem>>, vector<8x32xf32>
    %cst = arith.constant dense<0xFF800000> : vector<8xf32>
    %1 = vector.multi_reduction <maximumf>, %0, %cst [1] : vector<8x32xf32> to vector<8xf32>
    %2 = vector.shape_cast %1 : vector<8xf32> to vector<8x1xf32>
    %3 = vector.broadcast %2 : vector<8x1xf32> to vector<8x32xf32>
    %4 = arith.subf %0, %3 : vector<8x32xf32>
    %5 = math.exp %4 : vector<8x32xf32>
    %cst_1 = arith.constant dense<0.000000e+00> : vector<8xf32>
    %6 = vector.multi_reduction <add>, %5, %cst_1 [1] : vector<8x32xf32> to vector<8xf32>
    %7 = vector.shape_cast %6 : vector<8xf32> to vector<8x1xf32>
    %8 = math.log %7 : vector<8x1xf32>
    %9 = tpu.iota {dimensions = array<i32: 1>} : vector<8x32xi32>
    %c0_2 = arith.constant 0 : index
    %c0_3 = arith.constant 0 : index
    %10 = vector.load %arg2[%c0_2, %c0_3] : memref<8x1xi32, #tpu.memory_space<vmem>>, vector<8x1xi32>
    %11 = vector.broadcast %10 : vector<8x1xi32> to vector<8x32xi32>
    %12 = arith.cmpi eq, %9, %11 : vector<8x32xi32>
    %cst_4 = arith.constant 0.899999976 : f32
    %cst_5 = arith.constant 0.0032258064 : f32
    %13 = vector.broadcast %cst_4 : f32 to vector<8x32xf32>
    %14 = vector.broadcast %cst_5 : f32 to vector<8x32xf32>
    %15 = arith.select %12, %13, %14 : vector<8x32xi1>, vector<8x32xf32>
    %16 = arith.mulf %15, %4 : vector<8x32xf32>
    %cst_6 = arith.constant dense<0.000000e+00> : vector<8xf32>
    %17 = vector.multi_reduction <add>, %16, %cst_6 [1] : vector<8x32xf32> to vector<8xf32>
    %18 = vector.shape_cast %17 : vector<8xf32> to vector<8x1xf32>
    %19 = arith.subf %8, %18 : vector<8x1xf32>
    %c8_i32 = arith.constant 8 : i32
    %20 = arith.muli %arg0, %c8_i32 : i32
    %21 = tpu.iota {dimensions = array<i32: 0>} : vector<8x1xi32>
    %22 = vector.broadcast %20 : i32 to vector<8x1xi32>
    %23 = arith.addi %22, %21 : vector<8x1xi32>
    %c8_i32_7 = arith.constant 8 : i32
    %24 = vector.broadcast %c8_i32_7 : i32 to vector<8x1xi32>
    %25 = arith.cmpi slt, %23, %24 : vector<8x1xi32>
    %cst_8 = arith.constant 0.000000e+00 : f32
    %26 = vector.broadcast %cst_8 : f32 to vector<8x1xf32>
    %27 = arith.select %25, %19, %26 : vector<8x1xi1>, vector<8x1xf32>
    %c0_9 = arith.constant 0 : index
    %c0_10 = arith.constant 0 : index
    %28 = vector.load %arg3[%c0_9, %c0_10] : memref<8x1xf32, #tpu.memory_space<vmem>>, vector<8x1xf32>
    tpu.vector_store %arg3[%c0_9, %c0_10], %27 {strides = array<i32>} : memref<8x1xf32, #tpu.memory_space<vmem>>, vector<8x1xf32>,
    return
  }
  func.func @transform_0(%arg0: i32) -> (i32, i32) {
    %c0_i32 = arith.constant 0 : i32
    %c0_i32_0 = arith.constant 0 : i32
    return %arg0, %c0_i32 : i32, i32
  }
  func.func @transform_1(%arg0: i32) -> (i32, i32) {
    %c0_i32 = arith.constant 0 : i32
    %c0_i32_0 = arith.constant 0 : i32
    return %arg0, %c0_i32 : i32, i32
  }
  func.func @transform_2(%arg0: i32) -> (i32, i32) {
    %c0_i32 = arith.constant 0 : i32
    %c0_i32_0 = arith.constant 0 : i32
    return %arg0, %c0_i32 : i32, i32
  }
}

</mosaic_0001>

<bundles_post_ra>
// kernel: tpu_custom_call.1
= control target key start
LH: loop header
LB: loop body
LE: loop exit
PB: predicated region body
PF: predicated region fallthrough
CT: control target
= control target key end

     0   :  { %vm12_vm0 = vcmask 261120   ;;  %v57_v1 = vmov 0   ;;  %v24_v7 = vlaneseq  ;;  %v58_v10 = vmov 0.0032258064   ;;  %s86_s0 = inlined_call_operand.vmem [shape: f32[8,32], index: 0, kind: input, shape index: {}]   ;;  %s87_s1 = inlined_call_operand.vmem [shape: s32[8,1], index: 1, kind: input, shape index: {}]   ;;  %s88_s2 = inlined_call_operand.vmem [shape: f32[8,1], index: 2, kind: output, shape index: {}]  }
   0x1   :  { %v11_v0 = vld [vmem:[%s86_s0] sm:$0xff]  ;;  %52 = vset.pattern.permute.xlu0 %v57_v1  ;;  %vm44_vm2 = vcmask 7168  }
   0x2   :  { %v13_v2 = vsel %vm12_vm0, %v11_v0, -inf  ;;  %v26_v3 = vld [vmem:[%s87_s1] sm:$0xff]  ;;  %v25_v8 = vand.u32 127, %v24_v7 }
   0x3   :  { %14 = vmax.xlane.f32.xlu0 %v13_v2 }
  0x19   :  { %28 = vperm.xlu0 %52, %v26_v3  }
  0x8c   :  { %v15_v4 = vpop.xlane.xlu0 %14 }
  0x8d   :  { %v16_v5 = vsub.f32 %v11_v0, %v15_v4 }
  0x8f   :  { %v17_v6 = vmul.f32 1.442695, %v16_v5 }
  0x91   :  { %53 = vpow2.f32 %v17_v6 }
  0x94   :  { %v29_v9 = vpop.permute.xlu0 %28 }
  0x95   :  { %vm30_vm1 = vcmp.eq.s32.totalorder %v25_v8, %v29_v9 }
  0x96   :  { %v31_v11 = vsel %vm30_vm1, 0.9, %v58_v10 }
  0x97   :  { %v32_v14 = vmul.f32 %v31_v11, %v16_v5 }
  0x99   :  { %v33_v15 = vsel %vm12_vm0, %v32_v14, 0.0 }
  0x9e   :  { %v54_v12 = vpop.eup %53 }
  0x9f   :  { %v19_v13 = vsel %vm12_vm0, %v54_v12, 0.0 }
  0xa0   :  { %20 = vadd.xlane.f32.xlu1 %v19_v13 }
  0xa4   :  { %34 = vadd.xlane.f32.xlu1 %v33_v15 }
 0x129   :  { %v21_v16 = vpop.xlane.xlu1 %20 }
 0x12a   :  { %55 = vlog2.f32 %v21_v16 }
 0x12d   :  { %v35_v19 = vpop.xlane.xlu1 %34 }
 0x137   :  { %v56_v17 = vpop.eup %55 }
 0x138   :  { %v23_v18 = vmul.f32 0.6931472, %v56_v17 }
 0x13a   :  { %v36_v20 = vsub.f32 %v23_v18, %v35_v19 }
 0x13c   :  { %45 = vst.msk [vmem:[%s88_s2] sm:$0xff] %vm44_vm2, %v36_v20 }

</bundles_post_ra>
